<compile_context>
chip_gen: v7x
topology: tpu7x:2x2x1
jax: 0.10.0
libtpu: 0.0.40
codegen_flags: <defaults>
</compile_context>

<pallas_src>
import functools

import jax
import jax.numpy as jnp
from jax.experimental import pallas as pl
from jax.experimental.pallas import tpu as pltpu

BN_EPS = 1e-5


# --------------------------- in-kernel helpers ------------------------------
def _build_taps(taps_ref, a, H, W):
    """Write the three 3x3-conv tap slabs (kernel rows ky = 0, 1, 2) to scratch.

    a        : (C, H*W) f32, spatial index p = y*W + x on the lane axis.
    taps_ref : (3, 3*C, H*W) bf16 VMEM scratch with
               taps_ref[ky][kx*C + c, p] == a[c, p + (ky-1)*W + (kx-1)]
               (zero where the tap falls outside the image).
    """
    C, F = a.shape
    p = jax.lax.broadcasted_iota(jnp.int32, (1, F), 1)
    m_l = (p % W != 0).astype(a.dtype)        # kill wrapped read at x == 0
    m_r = (p % W != W - 1).astype(a.dtype)    # kill wrapped read at x == W-1
    m_t = (p >= W).astype(a.dtype)            # kill wrapped read at y == 0
    m_b = (p < F - W).astype(a.dtype)         # kill wrapped read at y == H-1

    # Column shifts (kx = 0 / 2). Non-negative shifts only: -1 == F-1 (cyclic).
    left = pltpu.roll(a, 1, axis=1) * m_l          # a[c, y, x-1]
    right = pltpu.roll(a, F - 1, axis=1) * m_r     # a[c, y, x+1]
    mid = jnp.concatenate([left, a, right], axis=0)          # (3C, F), ky = 1
    # Row shifts (ky = 0 / 2) applied to the whole slab: one roll + one mask each.
    up = pltpu.roll(mid, W, axis=1) * m_t          # reads row y-1   (ky = 0)
    down = pltpu.roll(mid, F - W, axis=1) * m_b    # reads row y+1   (ky = 2)

    taps_ref[0] = up.astype(taps_ref.dtype)
    taps_ref[1] = mid.astype(taps_ref.dtype)
    taps_ref[2] = down.astype(taps_ref.dtype)


def _conv_accum(w_ref, taps_ref):
    """3 accumulating bf16 MXU matmuls (one per kernel row), f32 accumulation."""
    acc = jnp.dot(w_ref[0], taps_ref[0], preferred_element_type=jnp.float32)
    acc = acc + jnp.dot(w_ref[1], taps_ref[1], preferred_element_type=jnp.float32)
    acc = acc + jnp.dot(w_ref[2], taps_ref[2], preferred_element_type=jnp.float32)
    return acc


def _store_with_stats(acc, h_ref, s_ref, q_ref):
    s_ref[0] = jnp.sum(acc, axis=1, keepdims=True)       # per-(sample, tile) sum
    q_ref[0] = jnp.sum(acc * acc, axis=1, keepdims=True)  # per-(sample, tile) sumsq
    h_ref[0] = acc.astype(h_ref.dtype)                    # bf16 activation store


# ------------------------------- kernels -------------------------------------
def _conv_stage1_kernel(x_ref, w_ref, h_ref, s_ref, q_ref, taps_ref, *, H, W):
    """conv1 (no bias) + BN1 partial statistics for one (sample, Cout-tile)."""
    @pl.when(pl.program_id(1) == 0)      # build taps once per sample, reuse per tile
    def _():
        _build_taps(taps_ref, x_ref[0].astype(jnp.float32), H, W)
    _store_with_stats(_conv_accum(w_ref, taps_ref), h_ref, s_ref, q_ref)


def _conv_stage2_kernel(h1_ref, sc_ref, sh_ref, w_ref, h_ref, s_ref, q_ref,
                        taps_ref, *, H, W):
    """BN1+ReLU (folded scale/shift) + conv2 (no bias) + BN2 partial stats."""
    @pl.when(pl.program_id(1) == 0)
    def _():
        a = jnp.maximum(h1_ref[0].astype(jnp.float32) * sc_ref[...] + sh_ref[...], 0.0)
        _build_taps(taps_ref, a, H, W)
    _store_with_stats(_conv_accum(w_ref, taps_ref), h_ref, s_ref, q_ref)


def _bn_relu_kernel(h_ref, sc_ref, sh_ref, o_ref):
    """Final BN2 + ReLU on a lane-dense 2-D (rows, H*W) view."""
    o_ref[...] = jnp.maximum(
        h_ref[...].astype(jnp.float32) * sc_ref[...] + sh_ref[...], 0.0)


# ------------------------------- wrapper --------------------------------------
def _scale_shift(psum, psumsq, gamma, beta, count):
    """Fold training-mode BN (biased variance) into per-channel scale/shift."""
    mean = psum.sum(axis=(0, 2)) / count
    ex2 = psumsq.sum(axis=(0, 2)) / count
    var = jnp.maximum(ex2 - mean * mean, 0.0)
    scale = gamma * jax.lax.rsqrt(var + BN_EPS)
    shift = beta - mean * scale
    return scale.reshape(-1, 1), shift.reshape(-1, 1)


def _pick_tile(extent, candidates):
    for c in candidates:
        if extent % c == 0:
            return c
    return extent


def _vmem_budget(*byte_counts):
    """Per-step footprint (double-buffered blocks + temporaries) with headroom."""
    need = 4 * sum(int(b) for b in byte_counts)
    return max(8 * 2**20, min(96 * 2**20, need))


@jax.jit
def double_conv(x_nchw, params):
    """x_nchw: (N, Cin, H, W) -> (N, Cout, H, W), matching PyTorch DoubleConv."""
    w1, b1, g1, be1, w2, b2, g2, be2 = params
    # Conv biases are exactly cancelled by training-mode BN mean subtraction.
    del b1, b2

    N, Cin, H, W = x_nchw.shape
    Cmid, Cout = w1.shape[0], w2.shape[0]
    F = H * W

    # Free reshape: channels on sublanes, flattened spatial on lanes; no transposes.
    xf = x_nchw.astype(jnp.float32).reshape(N, Cin, F)
    # Weight layout per kernel row ky: columns ordered (kx, ci); bf16 for the MXU.
    w1k = jnp.transpose(w1, (2, 0, 3, 1)).reshape(3, Cmid, 3 * Cin).astype(jnp.bfloat16)
    w2k = jnp.transpose(w2, (2, 0, 3, 1)).reshape(3, Cout, 3 * Cmid).astype(jnp.bfloat16)

    ct1 = _pick_tile(Cmid, (128, 64, 32, 16, 8))
    ct2 = _pick_tile(Cout, (128, 64, 32, 16, 8))

    def conv_params(cin, ctile):
        blocks = cin * F * 4 + 3 * ctile * 3 * cin * 2 + ctile * F * 2 + 2 * ctile * 4
        temps = 3 * 3 * cin * F * 2 + 5 * 3 * cin * F * 4 + ctile * F * 4
        return pltpu.CompilerParams(
            dimension_semantics=("parallel", "arbitrary"),
            vmem_limit_bytes=_vmem_budget(blocks, temps))

    # ---- pass 1: conv1 + per-sample BN1 partial statistics --------------------
    h1, s1, q1 = pl.pallas_call(
        functools.partial(_conv_stage1_kernel, H=H, W=W),
        grid=(N, Cmid // ct1),
        in_specs=[
            pl.BlockSpec((1, Cin, F), lambda n, c: (n, 0, 0)),       # reused across c
            pl.BlockSpec((3, ct1, 3 * Cin), lambda n, c: (0, c, 0)),
        ],
        out_specs=(
            pl.BlockSpec((1, ct1, F), lambda n, c: (n, c, 0)),
            pl.BlockSpec((1, ct1, 1), lambda n, c: (n, c, 0)),
            pl.BlockSpec((1, ct1, 1), lambda n, c: (n, c, 0)),
        ),
        out_shape=(
            jax.ShapeDtypeStruct((N, Cmid, F), jnp.bfloat16),
            jax.ShapeDtypeStruct((N, Cmid, 1), jnp.float32),
            jax.ShapeDtypeStruct((N, Cmid, 1), jnp.float32),
        ),
        scratch_shapes=[pltpu.VMEM((3, 3 * Cin, F), jnp.bfloat16)],
        compiler_params=conv_params(Cin, ct1),
    )(xf, w1k)

    sc1, sh1 = _scale_shift(s1, q1, g1.astype(jnp.float32), be1.astype(jnp.float32), N * F)

    # ---- pass 2: BN1 + ReLU + conv2 + per-sample BN2 partial statistics -------
    h2, s2, q2 = pl.pallas_call(
        functools.partial(_conv_stage2_kernel, H=H, W=W),
        grid=(N, Cout // ct2),
        in_specs=[
            pl.BlockSpec((1, Cmid, F), lambda n, c: (n, 0, 0)),
            pl.BlockSpec((Cmid, 1), lambda n, c: (0, 0)),
            pl.BlockSpec((Cmid, 1), lambda n, c: (0, 0)),
            pl.BlockSpec((3, ct2, 3 * Cmid), lambda n, c: (0, c, 0)),
        ],
        out_specs=(
            pl.BlockSpec((1, ct2, F), lambda n, c: (n, c, 0)),
            pl.BlockSpec((1, ct2, 1), lambda n, c: (n, c, 0)),
            pl.BlockSpec((1, ct2, 1), lambda n, c: (n, c, 0)),
        ),
        out_shape=(
            jax.ShapeDtypeStruct((N, Cout, F), jnp.bfloat16),
            jax.ShapeDtypeStruct((N, Cout, 1), jnp.float32),
            jax.ShapeDtypeStruct((N, Cout, 1), jnp.float32),
        ),
        scratch_shapes=[pltpu.VMEM((3, 3 * Cmid, F), jnp.bfloat16)],
        compiler_params=conv_params(Cmid, ct2),
    )(h1, sc1, sh1, w2k)

    sc2, sh2 = _scale_shift(s2, q2, g2.astype(jnp.float32), be2.astype(jnp.float32), N * F)

    # ---- pass 3: BN2 + ReLU on a lane-dense 2-D view with large tiles ----------
    rows = N * Cout
    rt = _pick_tile(rows, (256, 128, 64, 32, 16, 8))
    h2_2d = h2.reshape(rows, F)                                    # free reshape
    sc2_r = jnp.broadcast_to(sc2.reshape(1, Cout, 1), (N, Cout, 1)).reshape(rows, 1)
    sh2_r = jnp.broadcast_to(sh2.reshape(1, Cout, 1), (N, Cout, 1)).reshape(rows, 1)

    out2d = pl.pallas_call(
        _bn_relu_kernel,
        grid=(rows // rt,),
        in_specs=[
            pl.BlockSpec((rt, F), lambda r: (r, 0)),
            pl.BlockSpec((rt, 1), lambda r: (r, 0)),
            pl.BlockSpec((rt, 1), lambda r: (r, 0)),
        ],
        out_specs=pl.BlockSpec((rt, F), lambda r: (r, 0)),
        out_shape=jax.ShapeDtypeStruct((rows, F), jnp.float32),
        compiler_params=pltpu.CompilerParams(
            dimension_semantics=("parallel",),
            vmem_limit_bytes=_vmem_budget(rt * F * 2, rt * F * 4, rt * 8)),
    )(h2_2d, sc2_r, sh2_r)

    return out2d.reshape(N, Cout, H, W)      # free reshape: already NCHW


# ---------------------- pure-JAX reference (for checking) ---------------------
def _reference(x_nchw, params):
    w1, b1, g1, be1, w2, b2, g2, be2 = params

    def conv(x, w, b):
        y = jax.lax.conv_general_dilated(
            x.astype(jnp.float32), w.astype(jnp.float32),
            window_strides=(1, 1), padding=((1, 1), (1, 1)),
            dimension_numbers=("NCHW", "OIHW", "NCHW"))
        return y + b.reshape(1, -1, 1, 1)

    def bn_relu(h, gamma, beta):
        mean = jnp.mean(h, axis=(0, 2, 3), keepdims=True)
        var = jnp.mean((h - mean) ** 2, axis=(0, 2, 3), keepdims=True)
        y = (h - mean) * jax.lax.rsqrt(var + BN_EPS)
        y = y * gamma.reshape(1, -1, 1, 1) + beta.reshape(1, -1, 1, 1)
        return jnp.maximum(y, 0.0)

    h = bn_relu(conv(x_nchw, w1, b1), g1, be1)
    return bn_relu(conv(h, w2, b2), g2, be2)


# ---------------------------------- main --------------------------------------
if __name__ == "__main__":
    N, Cin, H, W = 2, 4, 16, 16
    Cmid = Cout = 8   # DoubleConv(in_channels=4, out_channels=8) -> mid = out

    key = jax.random.PRNGKey(0)
    k_x, k_w1, k_b1, k_w2, k_b2 = jax.random.split(key, 5)

    x = jax.random.normal(k_x, (N, Cin, H, W), dtype=jnp.float32)

    # Torch-shaped parameters; BN gamma=1, beta=0 (fresh nn.BatchNorm2d defaults).
    w1 = 0.1 * jax.random.normal(k_w1, (Cmid, Cin, 3, 3), dtype=jnp.float32)
    b1 = 0.1 * jax.random.normal(k_b1, (Cmid,), dtype=jnp.float32)
    g1 = jnp.ones((Cmid,), jnp.float32)
    be1 = jnp.zeros((Cmid,), jnp.float32)
    w2 = 0.1 * jax.random.normal(k_w2, (Cout, Cmid, 3, 3), dtype=jnp.float32)
    b2 = 0.1 * jax.random.normal(k_b2, (Cout,), dtype=jnp.float32)
    g2 = jnp.ones((Cout,), jnp.float32)
    be2 = jnp.zeros((Cout,), jnp.float32)

    params = (w1, b1, g1, be1, w2, b2, g2, be2)

    out = jax.block_until_ready(double_conv(x, params))
    ref = jax.block_until_ready(_reference(x, params))

    assert out.shape == (N, Cout, H, W), out.shape
    # bf16 matmul operands / bf16 intermediates (f32 accumulation): expected
    # ~1e-2 max abs error vs the pure-f32 reference on unit-variance BN outputs.
    assert jnp.allclose(out, ref, atol=5e-2, rtol=5e-2), \
        f"max abs err {jnp.max(jnp.abs(out - ref))}"

    print("KERNEL_OK")
</pallas_src>

<mosaic_0001>
module attributes {stable_mosaic.version = 11 : i64} {
  func.func @_conv_stage1_kernel(%arg0: i32, %arg1: i32, %arg2: memref<1x4x256xf32, #tpu.memory_space<vmem>>, %arg3: memref<3x8x12xbf16, #tpu.memory_space<vmem>>, %arg4: memref<1x8x256xbf16, #tpu.memory_space<vmem>>, %arg5: memref<1x8x1xf32, #tpu.memory_space<vmem>>, %arg6: memref<1x8x1xf32, #tpu.memory_space<vmem>>, %arg7: memref<3x12x256xbf16, #tpu.memory_space<vmem>>) attributes {dimension_semantics = [#tpu.dimension_semantics<parallel>, #tpu.dimension_semantics<arbitrary>], iteration_bounds = array<i64: 2, 1>, scalar_prefetch = 0 : i64, scratch_operands = 1 : i64, tpu.core_type = #tpu.core_type<tc>, window_params = [{transform_indices = @transform_0, window_bounds = array<i64: 1, 4, 256>}, {transform_indices = @transform_1, window_bounds = array<i64: 3, 8, 12>}, {transform_indices = @transform_2, window_bounds = array<i64: 1, 8, 256>}, {transform_indices = @transform_3, window_bounds = array<i64: 1, 8, 1>}, {transform_indices = @transform_4, window_bounds = array<i64: 1, 8, 1>}]} {
    %c0_i32 = arith.constant 0 : i32
    %0 = arith.cmpi eq, %arg1, %c0_i32 : i32
    %1 = arith.extui %0 : i1 to i32
    %c0_i32_0 = arith.constant 0 : i32
    %2 = arith.cmpi ne, %1, %c0_i32_0 : i32
    scf.if %2 {
      %c0_29 = arith.constant 0 : index
      %c0_30 = arith.constant 0 : index
      %c0_31 = arith.constant 0 : index
      %35 = vector.load %arg2[%c0_29, %c0_30, %c0_31] : memref<1x4x256xf32, #tpu.memory_space<vmem>>, vector<1x4x256xf32>
      %36 = vector.shape_cast %35 : vector<1x4x256xf32> to vector<4x256xf32>
      %37 = tpu.iota {dimensions = array<i32: 1>} : vector<1x256xi32>
      %c16_i32 = arith.constant 16 : i32
      %c0_i32_32 = arith.constant 0 : i32
      %38 = arith.cmpi eq, %c16_i32, %c0_i32_32 : i32
      %c1_i32 = arith.constant 1 : i32
      %39 = arith.select %38, %c1_i32, %c16_i32 : i32
      %40 = vector.broadcast %39 : i32 to vector<1x256xi32>
      %41 = arith.remsi %37, %40 : vector<1x256xi32>
      %c0_i32_33 = arith.constant 0 : i32
      %42 = vector.broadcast %c0_i32_33 : i32 to vector<1x256xi32>
      %43 = arith.cmpi ne, %41, %42 : vector<1x256xi32>
      %c0_i32_34 = arith.constant 0 : i32
      %44 = vector.broadcast %c0_i32_34 : i32 to vector<1x256xi32>
      %45 = arith.cmpi slt, %41, %44 : vector<1x256xi32>
      %c0_i32_35 = arith.constant 0 : i32
      %46 = arith.cmpi slt, %39, %c0_i32_35 : i32
      %47 = vector.broadcast %46 : i1 to vector<1x256xi1>
      %48 = vector.broadcast %47 : vector<1x256xi1> to vector<1x256xi1>
      %49 = arith.xori %45, %48 : vector<1x256xi1>
      %50 = arith.andi %49, %43 : vector<1x256xi1>
      %51 = vector.broadcast %39 : i32 to vector<1x256xi32>
      %52 = arith.addi %41, %51 : vector<1x256xi32>
      %53 = arith.select %50, %52, %41 : vector<1x256xi1>, vector<1x256xi32>
      %c0_i32_36 = arith.constant 0 : i32
      %54 = vector.broadcast %c0_i32_36 : i32 to vector<1x256xi32>
      %55 = arith.cmpi ne, %53, %54 : vector<1x256xi32>
      %56 = arith.extui %55 : vector<1x256xi1> to vector<1x256xi32>
      %57 = arith.sitofp %56 : vector<1x256xi32> to vector<1x256xf32>
      %c16_i32_37 = arith.constant 16 : i32
      %c0_i32_38 = arith.constant 0 : i32
      %58 = arith.cmpi eq, %c16_i32_37, %c0_i32_38 : i32
      %c1_i32_39 = arith.constant 1 : i32
      %59 = arith.select %58, %c1_i32_39, %c16_i32_37 : i32
      %60 = vector.broadcast %59 : i32 to vector<1x256xi32>
      %61 = arith.remsi %37, %60 : vector<1x256xi32>
      %c0_i32_40 = arith.constant 0 : i32
      %62 = vector.broadcast %c0_i32_40 : i32 to vector<1x256xi32>
      %63 = arith.cmpi ne, %61, %62 : vector<1x256xi32>
      %c0_i32_41 = arith.constant 0 : i32
      %64 = vector.broadcast %c0_i32_41 : i32 to vector<1x256xi32>
      %65 = arith.cmpi slt, %61, %64 : vector<1x256xi32>
      %c0_i32_42 = arith.constant 0 : i32
      %66 = arith.cmpi slt, %59, %c0_i32_42 : i32
      %67 = vector.broadcast %66 : i1 to vector<1x256xi1>
      %68 = vector.broadcast %67 : vector<1x256xi1> to vector<1x256xi1>
      %69 = arith.xori %65, %68 : vector<1x256xi1>
      %70 = arith.andi %69, %63 : vector<1x256xi1>
      %71 = vector.broadcast %59 : i32 to vector<1x256xi32>
      %72 = arith.addi %61, %71 : vector<1x256xi32>
      %73 = arith.select %70, %72, %61 : vector<1x256xi1>, vector<1x256xi32>
      %c15_i32 = arith.constant 15 : i32
      %74 = vector.broadcast %c15_i32 : i32 to vector<1x256xi32>
      %75 = arith.cmpi ne, %73, %74 : vector<1x256xi32>
      %76 = arith.extui %75 : vector<1x256xi1> to vector<1x256xi32>
      %77 = arith.sitofp %76 : vector<1x256xi32> to vector<1x256xf32>
      %c16_i32_43 = arith.constant 16 : i32
      %78 = vector.broadcast %c16_i32_43 : i32 to vector<1x256xi32>
      %79 = arith.cmpi sge, %37, %78 : vector<1x256xi32>
      %80 = arith.extui %79 : vector<1x256xi1> to vector<1x256xi32>
      %81 = arith.sitofp %80 : vector<1x256xi32> to vector<1x256xf32>
      %c240_i32 = arith.constant 240 : i32
      %82 = vector.broadcast %c240_i32 : i32 to vector<1x256xi32>
      %83 = arith.cmpi slt, %37, %82 : vector<1x256xi32>
      %84 = arith.extui %83 : vector<1x256xi1> to vector<1x256xi32>
      %85 = arith.sitofp %84 : vector<1x256xi32> to vector<1x256xf32>
      %c1_i32_44 = arith.constant 1 : i32
      %86 = tpu.dynamic_rotate %36 by %c1_i32_44 dim 1 : vector<4x256xf32>, i32 -> vector<4x256xf32>
      %87 = vector.broadcast %57 : vector<1x256xf32> to vector<4x256xf32>
      %88 = arith.mulf %86, %87 : vector<4x256xf32>
      %c255_i32 = arith.constant 255 : i32
      %89 = tpu.dynamic_rotate %36 by %c255_i32 dim 1 : vector<4x256xf32>, i32 -> vector<4x256xf32>
      %90 = vector.broadcast %77 : vector<1x256xf32> to vector<4x256xf32>
      %91 = arith.mulf %89, %90 : vector<4x256xf32>
      %92 = tpu.concatenate %88, %36, %91 in 0 : vector<4x256xf32>, vector<4x256xf32>, vector<4x256xf32> -> vector<12x256xf32>
      %c16_i32_45 = arith.constant 16 : i32
      %93 = tpu.dynamic_rotate %92 by %c16_i32_45 dim 1 : vector<12x256xf32>, i32 -> vector<12x256xf32>
      %94 = vector.broadcast %81 : vector<1x256xf32> to vector<12x256xf32>
      %95 = arith.mulf %93, %94 : vector<12x256xf32>
      %c240_i32_46 = arith.constant 240 : i32
      %96 = tpu.dynamic_rotate %92 by %c240_i32_46 dim 1 : vector<12x256xf32>, i32 -> vector<12x256xf32>
      %97 = vector.broadcast %85 : vector<1x256xf32> to vector<12x256xf32>
      %98 = arith.mulf %96, %97 : vector<12x256xf32>
      %99 = arith.truncf %95 : vector<12x256xf32> to vector<12x256xbf16>
      %c0_47 = arith.constant 0 : index
      %c0_48 = arith.constant 0 : index
      %c0_49 = arith.constant 0 : index
      %100 = vector.load %arg7[%c0_47, %c0_48, %c0_49] : memref<3x12x256xbf16, #tpu.memory_space<vmem>>, vector<1x12x256xbf16>
      %101 = vector.shape_cast %100 : vector<1x12x256xbf16> to vector<12x256xbf16>
      %102 = vector.shape_cast %99 : vector<12x256xbf16> to vector<1x12x256xbf16>
      tpu.vector_store %arg7[%c0_47, %c0_48, %c0_49], %102 {strides = array<i32>} : memref<3x12x256xbf16, #tpu.memory_space<vmem>>, vector<1x12x256xbf16>,
      %103 = arith.truncf %92 : vector<12x256xf32> to vector<12x256xbf16>
      %c1_50 = arith.constant 1 : index
      %c0_51 = arith.constant 0 : index
      %c0_52 = arith.constant 0 : index
      %104 = vector.load %arg7[%c1_50, %c0_51, %c0_52] : memref<3x12x256xbf16, #tpu.memory_space<vmem>>, vector<1x12x256xbf16>
      %105 = vector.shape_cast %104 : vector<1x12x256xbf16> to vector<12x256xbf16>
      %106 = vector.shape_cast %103 : vector<12x256xbf16> to vector<1x12x256xbf16>
      tpu.vector_store %arg7[%c1_50, %c0_51, %c0_52], %106 {strides = array<i32>} : memref<3x12x256xbf16, #tpu.memory_space<vmem>>, vector<1x12x256xbf16>,
      %107 = arith.truncf %98 : vector<12x256xf32> to vector<12x256xbf16>
      %c2_53 = arith.constant 2 : index
      %c0_54 = arith.constant 0 : index
      %c0_55 = arith.constant 0 : index
      %108 = vector.load %arg7[%c2_53, %c0_54, %c0_55] : memref<3x12x256xbf16, #tpu.memory_space<vmem>>, vector<1x12x256xbf16>
      %109 = vector.shape_cast %108 : vector<1x12x256xbf16> to vector<12x256xbf16>
      %110 = vector.shape_cast %107 : vector<12x256xbf16> to vector<1x12x256xbf16>
      tpu.vector_store %arg7[%c2_53, %c0_54, %c0_55], %110 {strides = array<i32>} : memref<3x12x256xbf16, #tpu.memory_space<vmem>>, vector<1x12x256xbf16>,
    } else {
    }
    %c0 = arith.constant 0 : index
    %c0_1 = arith.constant 0 : index
    %c0_2 = arith.constant 0 : index
    %3 = vector.load %arg3[%c0, %c0_1, %c0_2] : memref<3x8x12xbf16, #tpu.memory_space<vmem>>, vector<1x8x12xbf16>
    %4 = vector.shape_cast %3 : vector<1x8x12xbf16> to vector<8x12xbf16>
    %c0_3 = arith.constant 0 : index
    %c0_4 = arith.constant 0 : index
    %c0_5 = arith.constant 0 : index
    %5 = vector.load %arg7[%c0_3, %c0_4, %c0_5] : memref<3x12x256xbf16, #tpu.memory_space<vmem>>, vector<1x12x256xbf16>
    %6 = vector.shape_cast %5 : vector<1x12x256xbf16> to vector<12x256xbf16>
    %cst = arith.constant dense<0.000000e+00> : vector<8x256xf32>
    %7 = tpu.matmul %4, %6, %cst {dimension_numbers = #tpu.dot_dimension_numbers<[1], [0], [0], [1], [0, 0, 1, 1], [], []>} : vector<8x12xbf16>, vector<12x256xbf16>, vector<8x256xf32> -> vector<8x256xf32>
    %c1 = arith.constant 1 : index
    %c0_6 = arith.constant 0 : index
    %c0_7 = arith.constant 0 : index
    %8 = vector.load %arg3[%c1, %c0_6, %c0_7] : memref<3x8x12xbf16, #tpu.memory_space<vmem>>, vector<1x8x12xbf16>
    %9 = vector.shape_cast %8 : vector<1x8x12xbf16> to vector<8x12xbf16>
    %c1_8 = arith.constant 1 : index
    %c0_9 = arith.constant 0 : index
    %c0_10 = arith.constant 0 : index
    %10 = vector.load %arg7[%c1_8, %c0_9, %c0_10] : memref<3x12x256xbf16, #tpu.memory_space<vmem>>, vector<1x12x256xbf16>
    %11 = vector.shape_cast %10 : vector<1x12x256xbf16> to vector<12x256xbf16>
    %cst_11 = arith.constant dense<0.000000e+00> : vector<8x256xf32>
    %12 = tpu.matmul %9, %11, %cst_11 {dimension_numbers = #tpu.dot_dimension_numbers<[1], [0], [0], [1], [0, 0, 1, 1], [], []>} : vector<8x12xbf16>, vector<12x256xbf16>, vector<8x256xf32> -> vector<8x256xf32>
    %13 = arith.addf %7, %12 : vector<8x256xf32>
    %c2 = arith.constant 2 : index
    %c0_12 = arith.constant 0 : index
    %c0_13 = arith.constant 0 : index
    %14 = vector.load %arg3[%c2, %c0_12, %c0_13] : memref<3x8x12xbf16, #tpu.memory_space<vmem>>, vector<1x8x12xbf16>
    %15 = vector.shape_cast %14 : vector<1x8x12xbf16> to vector<8x12xbf16>
    %c2_14 = arith.constant 2 : index
    %c0_15 = arith.constant 0 : index
    %c0_16 = arith.constant 0 : index
    %16 = vector.load %arg7[%c2_14, %c0_15, %c0_16] : memref<3x12x256xbf16, #tpu.memory_space<vmem>>, vector<1x12x256xbf16>
    %17 = vector.shape_cast %16 : vector<1x12x256xbf16> to vector<12x256xbf16>
    %cst_17 = arith.constant dense<0.000000e+00> : vector<8x256xf32>
    %18 = tpu.matmul %15, %17, %cst_17 {dimension_numbers = #tpu.dot_dimension_numbers<[1], [0], [0], [1], [0, 0, 1, 1], [], []>} : vector<8x12xbf16>, vector<12x256xbf16>, vector<8x256xf32> -> vector<8x256xf32>
    %19 = arith.addf %13, %18 : vector<8x256xf32>
    %cst_18 = arith.constant dense<0.000000e+00> : vector<8xf32>
    %20 = vector.multi_reduction <add>, %19, %cst_18 [1] : vector<8x256xf32> to vector<8xf32>
    %21 = vector.shape_cast %20 : vector<8xf32> to vector<8x1xf32>
    %c0_19 = arith.constant 0 : index
    %c0_20 = arith.constant 0 : index
    %c0_21 = arith.constant 0 : index
    %22 = vector.load %arg5[%c0_19, %c0_20, %c0_21] : memref<1x8x1xf32, #tpu.memory_space<vmem>>, vector<1x8x1xf32>
    %23 = vector.shape_cast %22 : vector<1x8x1xf32> to vector<8x1xf32>
    %24 = vector.shape_cast %21 : vector<8x1xf32> to vector<1x8x1xf32>
    tpu.vector_store %arg5[%c0_19, %c0_20, %c0_21], %24 {strides = array<i32>} : memref<1x8x1xf32, #tpu.memory_space<vmem>>, vector<1x8x1xf32>,
    %25 = arith.mulf %19, %19 : vector<8x256xf32>
    %cst_22 = arith.constant dense<0.000000e+00> : vector<8xf32>
    %26 = vector.multi_reduction <add>, %25, %cst_22 [1] : vector<8x256xf32> to vector<8xf32>
    %27 = vector.shape_cast %26 : vector<8xf32> to vector<8x1xf32>
    %c0_23 = arith.constant 0 : index
    %c0_24 = arith.constant 0 : index
    %c0_25 = arith.constant 0 : index
    %28 = vector.load %arg6[%c0_23, %c0_24, %c0_25] : memref<1x8x1xf32, #tpu.memory_space<vmem>>, vector<1x8x1xf32>
    %29 = vector.shape_cast %28 : vector<1x8x1xf32> to vector<8x1xf32>
    %30 = vector.shape_cast %27 : vector<8x1xf32> to vector<1x8x1xf32>
    tpu.vector_store %arg6[%c0_23, %c0_24, %c0_25], %30 {strides = array<i32>} : memref<1x8x1xf32, #tpu.memory_space<vmem>>, vector<1x8x1xf32>,
    %31 = arith.truncf %19 : vector<8x256xf32> to vector<8x256xbf16>
    %c0_26 = arith.constant 0 : index
    %c0_27 = arith.constant 0 : index
    %c0_28 = arith.constant 0 : index
    %32 = vector.load %arg4[%c0_26, %c0_27, %c0_28] : memref<1x8x256xbf16, #tpu.memory_space<vmem>>, vector<1x8x256xbf16>
    %33 = vector.shape_cast %32 : vector<1x8x256xbf16> to vector<8x256xbf16>
    %34 = vector.shape_cast %31 : vector<8x256xbf16> to vector<1x8x256xbf16>
    tpu.vector_store %arg4[%c0_26, %c0_27, %c0_28], %34 {strides = array<i32>} : memref<1x8x256xbf16, #tpu.memory_space<vmem>>, vector<1x8x256xbf16>,
    return
  }
  func.func @transform_0(%arg0: i32, %arg1: i32) -> (i32, i32, i32) {
    %c0_i32 = arith.constant 0 : i32
    %c0_i32_0 = arith.constant 0 : i32
    %c0_i32_1 = arith.constant 0 : i32
    return %arg0, %c0_i32, %c0_i32_0 : i32, i32, i32
  }
  func.func @transform_1(%arg0: i32, %arg1: i32) -> (i32, i32, i32) {
    %c0_i32 = arith.constant 0 : i32
    %c0_i32_0 = arith.constant 0 : i32
    %c0_i32_1 = arith.constant 0 : i32
    return %c0_i32, %arg1, %c0_i32_0 : i32, i32, i32
  }
  func.func @transform_2(%arg0: i32, %arg1: i32) -> (i32, i32, i32) {
    %c0_i32 = arith.constant 0 : i32
    %c0_i32_0 = arith.constant 0 : i32
    return %arg0, %arg1, %c0_i32 : i32, i32, i32
  }
  func.func @transform_3(%arg0: i32, %arg1: i32) -> (i32, i32, i32) {
    %c0_i32 = arith.constant 0 : i32
    %c0_i32_0 = arith.constant 0 : i32
    return %arg0, %arg1, %c0_i32 : i32, i32, i32
  }
  func.func @transform_4(%arg0: i32, %arg1: i32) -> (i32, i32, i32) {
    %c0_i32 = arith.constant 0 : i32
    %c0_i32_0 = arith.constant 0 : i32
    return %arg0, %arg1, %c0_i32 : i32, i32, i32
  }
}

module attributes {stable_mosaic.version = 11 : i64} {
  func.func @_conv_stage2_kernel(%arg0: i32, %arg1: i32, %arg2: memref<1x8x256xbf16, #tpu.memory_space<vmem>>, %arg3: memref<8x1xf32, #tpu.memory_space<vmem>>, %arg4: memref<8x1xf32, #tpu.memory_space<vmem>>, %arg5: memref<3x8x24xbf16, #tpu.memory_space<vmem>>, %arg6: memref<1x8x256xbf16, #tpu.memory_space<vmem>>, %arg7: memref<1x8x1xf32, #tpu.memory_space<vmem>>, %arg8: memref<1x8x1xf32, #tpu.memory_space<vmem>>, %arg9: memref<3x24x256xbf16, #tpu.memory_space<vmem>>) attributes {dimension_semantics = [#tpu.dimension_semantics<parallel>, #tpu.dimension_semantics<arbitrary>], iteration_bounds = array<i64: 2, 1>, scalar_prefetch = 0 : i64, scratch_operands = 1 : i64, tpu.core_type = #tpu.core_type<tc>, window_params = [{transform_indices = @transform_0, window_bounds = array<i64: 1, 8, 256>}, {pipeline_mode = #tpu.pipeline_mode<synchronous>, transform_indices = @transform_1, window_bounds = array<i64: 8, 1>}, {pipeline_mode = #tpu.pipeline_mode<synchronous>, transform_indices = @transform_2, window_bounds = array<i64: 8, 1>}, {transform_indices = @transform_3, window_bounds = array<i64: 3, 8, 24>}, {transform_indices = @transform_4, window_bounds = array<i64: 1, 8, 256>}, {transform_indices = @transform_5, window_bounds = array<i64: 1, 8, 1>}, {transform_indices = @transform_6, window_bounds = array<i64: 1, 8, 1>}]} {
    %c0_i32 = arith.constant 0 : i32
    %0 = arith.cmpi eq, %arg1, %c0_i32 : i32
    %1 = arith.extui %0 : i1 to i32
    %c0_i32_0 = arith.constant 0 : i32
    %2 = arith.cmpi ne, %1, %c0_i32_0 : i32
    scf.if %2 {
      %c0_29 = arith.constant 0 : index
      %c0_30 = arith.constant 0 : index
      %c0_31 = arith.constant 0 : index
      %35 = vector.load %arg2[%c0_29, %c0_30, %c0_31] : memref<1x8x256xbf16, #tpu.memory_space<vmem>>, vector<1x8x256xbf16>
      %36 = vector.shape_cast %35 : vector<1x8x256xbf16> to vector<8x256xbf16>
      %37 = arith.extf %36 : vector<8x256xbf16> to vector<8x256xf32>
      %c0_32 = arith.constant 0 : index
      %c0_33 = arith.constant 0 : index
      %38 = vector.load %arg3[%c0_32, %c0_33] : memref<8x1xf32, #tpu.memory_space<vmem>>, vector<8x1xf32>
      %39 = vector.broadcast %38 : vector<8x1xf32> to vector<8x256xf32>
      %40 = arith.mulf %37, %39 : vector<8x256xf32>
      %c0_34 = arith.constant 0 : index
      %c0_35 = arith.constant 0 : index
      %41 = vector.load %arg4[%c0_34, %c0_35] : memref<8x1xf32, #tpu.memory_space<vmem>>, vector<8x1xf32>
      %42 = vector.broadcast %41 : vector<8x1xf32> to vector<8x256xf32>
      %43 = arith.addf %40, %42 : vector<8x256xf32>
      %cst_36 = arith.constant 0.000000e+00 : f32
      %44 = vector.broadcast %cst_36 : f32 to vector<8x256xf32>
      %45 = arith.maximumf %43, %44 : vector<8x256xf32>
      %46 = tpu.iota {dimensions = array<i32: 1>} : vector<1x256xi32>
      %c16_i32 = arith.constant 16 : i32
      %c0_i32_37 = arith.constant 0 : i32
      %47 = arith.cmpi eq, %c16_i32, %c0_i32_37 : i32
      %c1_i32 = arith.constant 1 : i32
      %48 = arith.select %47, %c1_i32, %c16_i32 : i32
      %49 = vector.broadcast %48 : i32 to vector<1x256xi32>
      %50 = arith.remsi %46, %49 : vector<1x256xi32>
      %c0_i32_38 = arith.constant 0 : i32
      %51 = vector.broadcast %c0_i32_38 : i32 to vector<1x256xi32>
      %52 = arith.cmpi ne, %50, %51 : vector<1x256xi32>
      %c0_i32_39 = arith.constant 0 : i32
      %53 = vector.broadcast %c0_i32_39 : i32 to vector<1x256xi32>
      %54 = arith.cmpi slt, %50, %53 : vector<1x256xi32>
      %c0_i32_40 = arith.constant 0 : i32
      %55 = arith.cmpi slt, %48, %c0_i32_40 : i32
      %56 = vector.broadcast %55 : i1 to vector<1x256xi1>
      %57 = vector.broadcast %56 : vector<1x256xi1> to vector<1x256xi1>
      %58 = arith.xori %54, %57 : vector<1x256xi1>
      %59 = arith.andi %58, %52 : vector<1x256xi1>
      %60 = vector.broadcast %48 : i32 to vector<1x256xi32>
      %61 = arith.addi %50, %60 : vector<1x256xi32>
      %62 = arith.select %59, %61, %50 : vector<1x256xi1>, vector<1x256xi32>
      %c0_i32_41 = arith.constant 0 : i32
      %63 = vector.broadcast %c0_i32_41 : i32 to vector<1x256xi32>
      %64 = arith.cmpi ne, %62, %63 : vector<1x256xi32>
      %65 = arith.extui %64 : vector<1x256xi1> to vector<1x256xi32>
      %66 = arith.sitofp %65 : vector<1x256xi32> to vector<1x256xf32>
      %c16_i32_42 = arith.constant 16 : i32
      %c0_i32_43 = arith.constant 0 : i32
      %67 = arith.cmpi eq, %c16_i32_42, %c0_i32_43 : i32
      %c1_i32_44 = arith.constant 1 : i32
      %68 = arith.select %67, %c1_i32_44, %c16_i32_42 : i32
      %69 = vector.broadcast %68 : i32 to vector<1x256xi32>
      %70 = arith.remsi %46, %69 : vector<1x256xi32>
      %c0_i32_45 = arith.constant 0 : i32
      %71 = vector.broadcast %c0_i32_45 : i32 to vector<1x256xi32>
      %72 = arith.cmpi ne, %70, %71 : vector<1x256xi32>
      %c0_i32_46 = arith.constant 0 : i32
      %73 = vector.broadcast %c0_i32_46 : i32 to vector<1x256xi32>
      %74 = arith.cmpi slt, %70, %73 : vector<1x256xi32>
      %c0_i32_47 = arith.constant 0 : i32
      %75 = arith.cmpi slt, %68, %c0_i32_47 : i32
      %76 = vector.broadcast %75 : i1 to vector<1x256xi1>
      %77 = vector.broadcast %76 : vector<1x256xi1> to vector<1x256xi1>
      %78 = arith.xori %74, %77 : vector<1x256xi1>
      %79 = arith.andi %78, %72 : vector<1x256xi1>
      %80 = vector.broadcast %68 : i32 to vector<1x256xi32>
      %81 = arith.addi %70, %80 : vector<1x256xi32>
      %82 = arith.select %79, %81, %70 : vector<1x256xi1>, vector<1x256xi32>
      %c15_i32 = arith.constant 15 : i32
      %83 = vector.broadcast %c15_i32 : i32 to vector<1x256xi32>
      %84 = arith.cmpi ne, %82, %83 : vector<1x256xi32>
      %85 = arith.extui %84 : vector<1x256xi1> to vector<1x256xi32>
      %86 = arith.sitofp %85 : vector<1x256xi32> to vector<1x256xf32>
      %c16_i32_48 = arith.constant 16 : i32
      %87 = vector.broadcast %c16_i32_48 : i32 to vector<1x256xi32>
      %88 = arith.cmpi sge, %46, %87 : vector<1x256xi32>
      %89 = arith.extui %88 : vector<1x256xi1> to vector<1x256xi32>
      %90 = arith.sitofp %89 : vector<1x256xi32> to vector<1x256xf32>
      %c240_i32 = arith.constant 240 : i32
      %91 = vector.broadcast %c240_i32 : i32 to vector<1x256xi32>
      %92 = arith.cmpi slt, %46, %91 : vector<1x256xi32>
      %93 = arith.extui %92 : vector<1x256xi1> to vector<1x256xi32>
      %94 = arith.sitofp %93 : vector<1x256xi32> to vector<1x256xf32>
      %c1_i32_49 = arith.constant 1 : i32
      %95 = tpu.dynamic_rotate %45 by %c1_i32_49 dim 1 : vector<8x256xf32>, i32 -> vector<8x256xf32>
      %96 = vector.broadcast %66 : vector<1x256xf32> to vector<8x256xf32>
      %97 = arith.mulf %95, %96 : vector<8x256xf32>
      %c255_i32 = arith.constant 255 : i32
      %98 = tpu.dynamic_rotate %45 by %c255_i32 dim 1 : vector<8x256xf32>, i32 -> vector<8x256xf32>
      %99 = vector.broadcast %86 : vector<1x256xf32> to vector<8x256xf32>
      %100 = arith.mulf %98, %99 : vector<8x256xf32>
      %101 = tpu.concatenate %97, %45, %100 in 0 : vector<8x256xf32>, vector<8x256xf32>, vector<8x256xf32> -> vector<24x256xf32>
      %c16_i32_50 = arith.constant 16 : i32
      %102 = tpu.dynamic_rotate %101 by %c16_i32_50 dim 1 : vector<24x256xf32>, i32 -> vector<24x256xf32>
      %103 = vector.broadcast %90 : vector<1x256xf32> to vector<24x256xf32>
      %104 = arith.mulf %102, %103 : vector<24x256xf32>
      %c240_i32_51 = arith.constant 240 : i32
      %105 = tpu.dynamic_rotate %101 by %c240_i32_51 dim 1 : vector<24x256xf32>, i32 -> vector<24x256xf32>
      %106 = vector.broadcast %94 : vector<1x256xf32> to vector<24x256xf32>
      %107 = arith.mulf %105, %106 : vector<24x256xf32>
      %108 = arith.truncf %104 : vector<24x256xf32> to vector<24x256xbf16>
      %c0_52 = arith.constant 0 : index
      %c0_53 = arith.constant 0 : index
      %c0_54 = arith.constant 0 : index
      %109 = vector.load %arg9[%c0_52, %c0_53, %c0_54] : memref<3x24x256xbf16, #tpu.memory_space<vmem>>, vector<1x24x256xbf16>
      %110 = vector.shape_cast %109 : vector<1x24x256xbf16> to vector<24x256xbf16>
      %111 = vector.shape_cast %108 : vector<24x256xbf16> to vector<1x24x256xbf16>
      tpu.vector_store %arg9[%c0_52, %c0_53, %c0_54], %111 {strides = array<i32>} : memref<3x24x256xbf16, #tpu.memory_space<vmem>>, vector<1x24x256xbf16>,
      %112 = arith.truncf %101 : vector<24x256xf32> to vector<24x256xbf16>
      %c1_55 = arith.constant 1 : index
      %c0_56 = arith.constant 0 : index
      %c0_57 = arith.constant 0 : index
      %113 = vector.load %arg9[%c1_55, %c0_56, %c0_57] : memref<3x24x256xbf16, #tpu.memory_space<vmem>>, vector<1x24x256xbf16>
      %114 = vector.shape_cast %113 : vector<1x24x256xbf16> to vector<24x256xbf16>
      %115 = vector.shape_cast %112 : vector<24x256xbf16> to vector<1x24x256xbf16>
      tpu.vector_store %arg9[%c1_55, %c0_56, %c0_57], %115 {strides = array<i32>} : memref<3x24x256xbf16, #tpu.memory_space<vmem>>, vector<1x24x256xbf16>,
      %116 = arith.truncf %107 : vector<24x256xf32> to vector<24x256xbf16>
      %c2_58 = arith.constant 2 : index
      %c0_59 = arith.constant 0 : index
      %c0_60 = arith.constant 0 : index
      %117 = vector.load %arg9[%c2_58, %c0_59, %c0_60] : memref<3x24x256xbf16, #tpu.memory_space<vmem>>, vector<1x24x256xbf16>
      %118 = vector.shape_cast %117 : vector<1x24x256xbf16> to vector<24x256xbf16>
      %119 = vector.shape_cast %116 : vector<24x256xbf16> to vector<1x24x256xbf16>
      tpu.vector_store %arg9[%c2_58, %c0_59, %c0_60], %119 {strides = array<i32>} : memref<3x24x256xbf16, #tpu.memory_space<vmem>>, vector<1x24x256xbf16>,
    } else {
    }
    %c0 = arith.constant 0 : index
    %c0_1 = arith.constant 0 : index
    %c0_2 = arith.constant 0 : index
    %3 = vector.load %arg5[%c0, %c0_1, %c0_2] : memref<3x8x24xbf16, #tpu.memory_space<vmem>>, vector<1x8x24xbf16>
    %4 = vector.shape_cast %3 : vector<1x8x24xbf16> to vector<8x24xbf16>
    %c0_3 = arith.constant 0 : index
    %c0_4 = arith.constant 0 : index
    %c0_5 = arith.constant 0 : index
    %5 = vector.load %arg9[%c0_3, %c0_4, %c0_5] : memref<3x24x256xbf16, #tpu.memory_space<vmem>>, vector<1x24x256xbf16>
    %6 = vector.shape_cast %5 : vector<1x24x256xbf16> to vector<24x256xbf16>
    %cst = arith.constant dense<0.000000e+00> : vector<8x256xf32>
    %7 = tpu.matmul %4, %6, %cst {dimension_numbers = #tpu.dot_dimension_numbers<[1], [0], [0], [1], [0, 0, 1, 1], [], []>} : vector<8x24xbf16>, vector<24x256xbf16>, vector<8x256xf32> -> vector<8x256xf32>
    %c1 = arith.constant 1 : index
    %c0_6 = arith.constant 0 : index
    %c0_7 = arith.constant 0 : index
    %8 = vector.load %arg5[%c1, %c0_6, %c0_7] : memref<3x8x24xbf16, #tpu.memory_space<vmem>>, vector<1x8x24xbf16>
    %9 = vector.shape_cast %8 : vector<1x8x24xbf16> to vector<8x24xbf16>
    %c1_8 = arith.constant 1 : index
    %c0_9 = arith.constant 0 : index
    %c0_10 = arith.constant 0 : index
    %10 = vector.load %arg9[%c1_8, %c0_9, %c0_10] : memref<3x24x256xbf16, #tpu.memory_space<vmem>>, vector<1x24x256xbf16>
    %11 = vector.shape_cast %10 : vector<1x24x256xbf16> to vector<24x256xbf16>
    %cst_11 = arith.constant dense<0.000000e+00> : vector<8x256xf32>
    %12 = tpu.matmul %9, %11, %cst_11 {dimension_numbers = #tpu.dot_dimension_numbers<[1], [0], [0], [1], [0, 0, 1, 1], [], []>} : vector<8x24xbf16>, vector<24x256xbf16>, vector<8x256xf32> -> vector<8x256xf32>
    %13 = arith.addf %7, %12 : vector<8x256xf32>
    %c2 = arith.constant 2 : index
    %c0_12 = arith.constant 0 : index
    %c0_13 = arith.constant 0 : index
    %14 = vector.load %arg5[%c2, %c0_12, %c0_13] : memref<3x8x24xbf16, #tpu.memory_space<vmem>>, vector<1x8x24xbf16>
    %15 = vector.shape_cast %14 : vector<1x8x24xbf16> to vector<8x24xbf16>
    %c2_14 = arith.constant 2 : index
    %c0_15 = arith.constant 0 : index
    %c0_16 = arith.constant 0 : index
    %16 = vector.load %arg9[%c2_14, %c0_15, %c0_16] : memref<3x24x256xbf16, #tpu.memory_space<vmem>>, vector<1x24x256xbf16>
    %17 = vector.shape_cast %16 : vector<1x24x256xbf16> to vector<24x256xbf16>
    %cst_17 = arith.constant dense<0.000000e+00> : vector<8x256xf32>
    %18 = tpu.matmul %15, %17, %cst_17 {dimension_numbers = #tpu.dot_dimension_numbers<[1], [0], [0], [1], [0, 0, 1, 1], [], []>} : vector<8x24xbf16>, vector<24x256xbf16>, vector<8x256xf32> -> vector<8x256xf32>
    %19 = arith.addf %13, %18 : vector<8x256xf32>
    %cst_18 = arith.constant dense<0.000000e+00> : vector<8xf32>
    %20 = vector.multi_reduction <add>, %19, %cst_18 [1] : vector<8x256xf32> to vector<8xf32>
    %21 = vector.shape_cast %20 : vector<8xf32> to vector<8x1xf32>
    %c0_19 = arith.constant 0 : index
    %c0_20 = arith.constant 0 : index
    %c0_21 = arith.constant 0 : index
    %22 = vector.load %arg7[%c0_19, %c0_20, %c0_21] : memref<1x8x1xf32, #tpu.memory_space<vmem>>, vector<1x8x1xf32>
    %23 = vector.shape_cast %22 : vector<1x8x1xf32> to vector<8x1xf32>
    %24 = vector.shape_cast %21 : vector<8x1xf32> to vector<1x8x1xf32>
    tpu.vector_store %arg7[%c0_19, %c0_20, %c0_21], %24 {strides = array<i32>} : memref<1x8x1xf32, #tpu.memory_space<vmem>>, vector<1x8x1xf32>,
    %25 = arith.mulf %19, %19 : vector<8x256xf32>
    %cst_22 = arith.constant dense<0.000000e+00> : vector<8xf32>
    %26 = vector.multi_reduction <add>, %25, %cst_22 [1] : vector<8x256xf32> to vector<8xf32>
    %27 = vector.shape_cast %26 : vector<8xf32> to vector<8x1xf32>
    %c0_23 = arith.constant 0 : index
    %c0_24 = arith.constant 0 : index
    %c0_25 = arith.constant 0 : index
    %28 = vector.load %arg8[%c0_23, %c0_24, %c0_25] : memref<1x8x1xf32, #tpu.memory_space<vmem>>, vector<1x8x1xf32>
    %29 = vector.shape_cast %28 : vector<1x8x1xf32> to vector<8x1xf32>
    %30 = vector.shape_cast %27 : vector<8x1xf32> to vector<1x8x1xf32>
    tpu.vector_store %arg8[%c0_23, %c0_24, %c0_25], %30 {strides = array<i32>} : memref<1x8x1xf32, #tpu.memory_space<vmem>>, vector<1x8x1xf32>,
    %31 = arith.truncf %19 : vector<8x256xf32> to vector<8x256xbf16>
    %c0_26 = arith.constant 0 : index
    %c0_27 = arith.constant 0 : index
    %c0_28 = arith.constant 0 : index
    %32 = vector.load %arg6[%c0_26, %c0_27, %c0_28] : memref<1x8x256xbf16, #tpu.memory_space<vmem>>, vector<1x8x256xbf16>
    %33 = vector.shape_cast %32 : vector<1x8x256xbf16> to vector<8x256xbf16>
    %34 = vector.shape_cast %31 : vector<8x256xbf16> to vector<1x8x256xbf16>
    tpu.vector_store %arg6[%c0_26, %c0_27, %c0_28], %34 {strides = array<i32>} : memref<1x8x256xbf16, #tpu.memory_space<vmem>>, vector<1x8x256xbf16>,
    return
  }
  func.func @transform_0(%arg0: i32, %arg1: i32) -> (i32, i32, i32) {
    %c0_i32 = arith.constant 0 : i32
    %c0_i32_0 = arith.constant 0 : i32
    %c0_i32_1 = arith.constant 0 : i32
    return %arg0, %c0_i32, %c0_i32_0 : i32, i32, i32
  }
  func.func @transform_1(%arg0: i32, %arg1: i32) -> (i32, i32) {
    %c0_i32 = arith.constant 0 : i32
    %c0_i32_0 = arith.constant 0 : i32
    %c0_i32_1 = arith.constant 0 : i32
    return %c0_i32, %c0_i32_0 : i32, i32
  }
  func.func @transform_2(%arg0: i32, %arg1: i32) -> (i32, i32) {
    %c0_i32 = arith.constant 0 : i32
    %c0_i32_0 = arith.constant 0 : i32
    %c0_i32_1 = arith.constant 0 : i32
    return %c0_i32, %c0_i32_0 : i32, i32
  }
  func.func @transform_3(%arg0: i32, %arg1: i32) -> (i32, i32, i32) {
    %c0_i32 = arith.constant 0 : i32
    %c0_i32_0 = arith.constant 0 : i32
    %c0_i32_1 = arith.constant 0 : i32
    return %c0_i32, %arg1, %c0_i32_0 : i32, i32, i32
  }
  func.func @transform_4(%arg0: i32, %arg1: i32) -> (i32, i32, i32) {
    %c0_i32 = arith.constant 0 : i32
    %c0_i32_0 = arith.constant 0 : i32
    return %arg0, %arg1, %c0_i32 : i32, i32, i32
  }
  func.func @transform_5(%arg0: i32, %arg1: i32) -> (i32, i32, i32) {
    %c0_i32 = arith.constant 0 : i32
    %c0_i32_0 = arith.constant 0 : i32
    return %arg0, %arg1, %c0_i32 : i32, i32, i32
  }
  func.func @transform_6(%arg0: i32, %arg1: i32) -> (i32, i32, i32) {
    %c0_i32 = arith.constant 0 : i32
    %c0_i32_0 = arith.constant 0 : i32
    return %arg0, %arg1, %c0_i32 : i32, i32, i32
  }
}

module attributes {stable_mosaic.version = 11 : i64} {
  func.func @_bn_relu_kernel(%arg0: i32, %arg1: memref<16x256xbf16, #tpu.memory_space<vmem>>, %arg2: memref<16x1xf32, #tpu.memory_space<vmem>>, %arg3: memref<16x1xf32, #tpu.memory_space<vmem>>, %arg4: memref<16x256xf32, #tpu.memory_space<vmem>>) attributes {dimension_semantics = [#tpu.dimension_semantics<parallel>], iteration_bounds = array<i64: 1>, scalar_prefetch = 0 : i64, scratch_operands = 0 : i64, tpu.core_type = #tpu.core_type<tc>, window_params = [{transform_indices = @transform_0, window_bounds = array<i64: 16, 256>}, {transform_indices = @transform_1, window_bounds = array<i64: 16, 1>}, {transform_indices = @transform_2, window_bounds = array<i64: 16, 1>}, {transform_indices = @transform_3, window_bounds = array<i64: 16, 256>}]} {
    %c0 = arith.constant 0 : index
    %c0_0 = arith.constant 0 : index
    %0 = vector.load %arg1[%c0, %c0_0] : memref<16x256xbf16, #tpu.memory_space<vmem>>, vector<16x256xbf16>
    %1 = arith.extf %0 : vector<16x256xbf16> to vector<16x256xf32>
    %c0_1 = arith.constant 0 : index
    %c0_2 = arith.constant 0 : index
    %2 = vector.load %arg2[%c0_1, %c0_2] : memref<16x1xf32, #tpu.memory_space<vmem>>, vector<16x1xf32>
    %3 = vector.broadcast %2 : vector<16x1xf32> to vector<16x256xf32>
    %4 = arith.mulf %1, %3 : vector<16x256xf32>
    %c0_3 = arith.constant 0 : index
    %c0_4 = arith.constant 0 : index
    %5 = vector.load %arg3[%c0_3, %c0_4] : memref<16x1xf32, #tpu.memory_space<vmem>>, vector<16x1xf32>
    %6 = vector.broadcast %5 : vector<16x1xf32> to vector<16x256xf32>
    %7 = arith.addf %4, %6 : vector<16x256xf32>
    %cst = arith.constant 0.000000e+00 : f32
    %8 = vector.broadcast %cst : f32 to vector<16x256xf32>
    %9 = arith.maximumf %7, %8 : vector<16x256xf32>
    %c0_5 = arith.constant 0 : index
    %c0_6 = arith.constant 0 : index
    %10 = vector.load %arg4[%c0_5, %c0_6] : memref<16x256xf32, #tpu.memory_space<vmem>>, vector<16x256xf32>
    tpu.vector_store %arg4[%c0_5, %c0_6], %9 {strides = array<i32>} : memref<16x256xf32, #tpu.memory_space<vmem>>, vector<16x256xf32>,
    return
  }
  func.func @transform_0(%arg0: i32) -> (i32, i32) {
    %c0_i32 = arith.constant 0 : i32
    %c0_i32_0 = arith.constant 0 : i32
    return %arg0, %c0_i32 : i32, i32
  }
  func.func @transform_1(%arg0: i32) -> (i32, i32) {
    %c0_i32 = arith.constant 0 : i32
    %c0_i32_0 = arith.constant 0 : i32
    return %arg0, %c0_i32 : i32, i32
  }
  func.func @transform_2(%arg0: i32) -> (i32, i32) {
    %c0_i32 = arith.constant 0 : i32
    %c0_i32_0 = arith.constant 0 : i32
    return %arg0, %c0_i32 : i32, i32
  }
  func.func @transform_3(%arg0: i32) -> (i32, i32) {
    %c0_i32 = arith.constant 0 : i32
    %c0_i32_0 = arith.constant 0 : i32
    return %arg0, %c0_i32 : i32, i32
  }
}

</mosaic_0001>

<bundles_post_ra>
// kernel: double_conv.5
= control target key start
LH: loop header
LB: loop body
LE: loop exit
PB: predicated region body
PF: predicated region fallthrough
CT: control target
= control target key end

     0   :  { %v67_v0 = vmov 0   ;;  %s118_s2 = inlined_call_operand.vmem [shape: f32[16,1], index: 2, kind: input, shape index: {}]   ;;  %s119_s1 = inlined_call_operand.vmem [shape: f32[16,1], index: 1, kind: input, shape index: {}]   ;;  %s120_s0 = inlined_call_operand.vmem [shape: bf16[16,256], index: 0, kind: input, shape index: {}]   ;;  %s121_s3 = inlined_call_operand.vmem [shape: f32[16,256], index: 3, kind: output, shape index: {}]  }
   0x1   :  { %66 = vset.pattern.permute.xlu1 %v67_v0  ;;  %65 = vset.pattern.permute.xlu0 %v67_v0  ;;  %v36_v1 = vld [vmem:[%s118_s2] sm:$0xff]  ;;  %v37_v3 = vld [vmem:[%s118_s2 + $0x8] sm:$0xff] }
   0x2   :  { %v20_v2 = vld [vmem:[%s119_s1] sm:$0xff]  ;;  %40 = vperm.xlu1 %66, %v36_v1   ;;  %v21_v4 = vld [vmem:[%s119_s1 + $0x8] sm:$0xff] }
   0x3   :  { %24 = vperm.xlu0 %65, %v20_v2   ;;  %v14_v5 = vld [vmem:[%s120_s0] sm:$0xff]  ;;  %v15_v8 = vld [vmem:[%s120_s0 + $0x8] sm:$0xff] }
   0x4   :  { %v16_v6 = vunpack.c.l.bf16 %v14_v5  ;;  %v17_v7 = vunpack.c.h.bf16 %v14_v5  ;;  %v18_v13 = vunpack.c.l.bf16 %v15_v8  ;;  %v19_v14 = vunpack.c.h.bf16 %v15_v8 }
   0x6   :  { %45 = vperm.xlu1 %66, %v37_v3  }
   0x7   :  { %29 = vperm.xlu0 %65, %v21_v4  }
  0x81   :  { %v41_v9 = vpop.permute.xlu1 %40 }
  0x82   :  { %v25_v10 = vpop.permute.xlu0 %24 }
  0x83   :  { %v32_v11 = vmul.f32 %v25_v10, %v16_v6  ;;  %v33_v12 = vmul.f32 %v25_v10, %v17_v7 }
  0x85   :  { %v48_v15 = vadd.f32 %v41_v9, %v32_v11  ;;  %v49_v16 = vadd.f32 %v41_v9, %v33_v12  ;;  %v46_v22 = vpop.permute.xlu1 %45 }
  0x86   :  { %v30_v17 = vpop.permute.xlu0 %29 }
  0x87   :  { %v52_v18 = vmax.f32 %v48_v15, 0.0  ;;  %v53_v19 = vmax.f32 %v49_v16, 0.0  ;;  %v34_v20 = vmul.f32 %v30_v17, %v18_v13  ;;  %v35_v21 = vmul.f32 %v30_v17, %v19_v14 }
  0x89   :  { %56 = vst [vmem:[%s121_s3] sm:$0xff] %v52_v18  ;;  %57 = vst [vmem:[%s121_s3 + $0x8] sm:$0xff] %v53_v19  ;;  %v50_v23 = vadd.f32 %v46_v22, %v34_v20  ;;  %v51_v24 = vadd.f32 %v46_v22, %v35_v21 }
  0x8b   :  { %v54_v25 = vmax.f32 %v50_v23, 0.0  ;;  %v55_v26 = vmax.f32 %v51_v24, 0.0 }
  0x8d   :  { %58 = vst [vmem:[%s121_s3 + $0x10] sm:$0xff] %v54_v25  ;;  %59 = vst [vmem:[%s121_s3 + $0x18] sm:$0xff] %v55_v26 }

// kernel: double_conv.3
= control target key start
LH: loop header
LB: loop body
LE: loop exit
PB: predicated region body
PF: predicated region fallthrough
CT: control target
= control target key end

     0   :  { %s970_s15 = smov 0   ;;  %s972_s16 = smov 0   ;;  %s1052_s0 = inlined_call_operand.vmem [shape: f32[2,4,256], index: 0, kind: input, shape index: {}]   ;;  %s1053_s1 = inlined_call_operand.vmem [shape: bf16[3,8,12], index: 1, kind: input, shape index: {}]   ;;  %s1054_s2 = inlined_call_operand.vmem [shape: bf16[2,8,256], index: 2, kind: output, shape index: {0}]   ;;  %s1055_s3 = inlined_call_operand.vmem [shape: f32[2,8,1], index: 3, kind: output, shape index: {1}]   ;;  %s1056_s4 = inlined_call_operand.vmem [shape: f32[2,8,1], index: 4, kind: output, shape index: {2}]  }
   0x1   :  { %s974_s17 = smov 0  }
   0x2 LB: > { %s27_s18 = sadd.s32 1, %s933_s16  ;;  %p832_p0 = scmp.ge.s32.totalorder %s937_s17, 1  ;;  %s937_s17 = sphi %s974_s17, %s15_s17   ;;  %s933_s16 = sphi %s972_s16, %s1058_s16   ;;  %s929_s15 = sphi %s970_s15, %s1057_s15  }
   0x3   : > { %p29_p1 = scmp.ge.s32.totalorder %s27_s18, 2  ;;  %p194_p2 = scmp.lt.s32.totalorder %s937_s17, 3 }
   0x5   : > { %s1060_s18 = smov (%p29_p1, %s27_s18), 0  ;;  %p195_p3 = pnand %p832_p0, %p194_p2 }
   0x6   : > { %p242_p4 = scmp.lt.s32.totalorder (!%p195_p3), %s929_s15, 1  ;;  %s939_s23 = smov (!%p195_p3), 127   ;;  %v280_v2 = vlaneseq (!%p195_p3)  ;;  %v941_v9 = vmov (!%p195_p3), 0.0   ;;  %vm354_vm6 = vcmask (!%p195_p3), 1043456   ;;  %v944_v29 = vmov (!%p195_p3), 0  }
   0x7   : > { %198 = sbr.rel (%p195_p3) target bundleno = 652 (0x28c), region = 28  ;;  %s940_s24 = smov (!%p195_p3), 1   ;;  %552 = vmatprep.mubr.bf16.mxu0 (!%p195_p3), %v944_v29  ;;  %vm455_vm7 = vcmask (!%p195_p3), 1045504   ;;  %494 = vmatprep.mubr.bf16.mxu1 (!%p195_p3), %v944_v29  ;;  %vm451_vm8 = vcmask (!%p195_p3), 97280   ;;  %v851_v34 = vld [vmem:[%s1053_s1 + $0x4] sm:$0xf] (!%p195_p3) }
   0x8   : > { %v994_v3 = vand.u32 (!%p195_p3), 127, %v280_v2  ;;  %s942_s25 = smov (!%p195_p3), 16   ;;  %s943_s26 = smov (!%p195_p3), 112   ;;  %vm629_vm13 = vcmask (!%p195_p3), 7168  }
   0xa   : > { %v997_v4 = vadd.s32 (!%p195_p3), 128, %v994_v3  ;;  %v287_v5 = vand.u32 (!%p195_p3), 15, %v994_v3  ;;  %vm347_vm4 = vcmp.lt.s32.totalorder (!%p195_p3), %v994_v3, 127  ;;  %vm338_vm5 = vcmp.lt.s32.totalorder (!%p195_p3), %v994_v3, 1 }
   0xb   : > { %vm319_vm9 = vcmp.ge.s32.totalorder (!%p195_p3), %v994_v3, 16  ;;  %vm365_vm10 = vcmp.lt.s32.totalorder (!%p195_p3), %v994_v3, 16  ;;  %vm382_vm12 = vcmp.lt.s32.totalorder (!%p195_p3), %v994_v3, 112 }
   0xc   : > { %v294_v6 = vand.u32 (!%p195_p3), 15, %v997_v4  ;;  %vm313_vm0 = vcmp.ne.s32.totalorder (!%p195_p3), %v287_v5, 15  ;;  %vm307_vm2 = vcmp.ne.s32.totalorder (!%p195_p3), %v287_v5, 0  ;;  %v843_v37 = vsel (!%p195_p3), %vm319_vm9, 1.0, %v941_v9 }
   0xd   : > { %v841_v10 = vsel (!%p195_p3), %vm313_vm0, 1.0, %v941_v9  ;;  %v839_v12 = vsel (!%p195_p3), %vm307_vm2, 1.0, %v941_v9  ;;  %vm326_vm11 = vcmp.lt.s32.totalorder (!%p195_p3), %v997_v4, 240 }
   0xe   : > { %s1062_s15 = smov (!%p242_p4, %s929_s15), 1  ;;  %vm314_vm1 = vcmp.ne.s32.totalorder %v294_v6, 15  ;;  %vm308_vm3 = vcmp.ne.s32.totalorder %v294_v6, 0  ;;  %v844_v50 = vsel %vm326_vm11, 1.0, %v941_v9  ;;  %v860_v6 = vld [vmem:[%s1053_s1 + $0x8] sm:$0xf] }
   0xf   : > { %s988_s19 = sshll.u32 %s1062_s15, 3  ;;  %v842_v11 = vsel %vm314_vm1, 1.0, %v941_v9  ;;  %v840_v13 = vsel %vm308_vm3, 1.0, %v941_v9 }
  0x10   : > { %s246_s22 = scalar_lea.vmem %s1052_s0, %s988_s19  ;;  %s259_s9 = scalar_lea.vmem %s1054_s2, %s988_s19 }
  0x11   : > { %v279_v0 = vld [vmem:[%s246_s22] sm:$0xff]  ;;  %s266_s12 = scalar_lea.vmem %s1055_s3, %s988_s19  ;;  %s273_s15 = scalar_lea.vmem %s1056_s4, %s988_s19 }
  0x12   : > { %343 = vrot.lane.b32.xlu1 %v279_v0, %s939_s23  ;;  %334 = vrot.lane.b32.xlu0 %v279_v0, %s940_s24  ;;  %v332_v1 = vcombine.high %v279_v0, %v279_v0  ;;  %v352_v16 = vcombine.low %v279_v0, %v279_v0 }
  0x16   : > { %345 = vrot.lane.b32.xlu1 %v332_v1, %s939_s23  ;;  %336 = vrot.lane.b32.xlu0 %v332_v1, %s940_s24  ;;  %v435_v1 = vld [vmem:[%s1053_s1] sm:$0xf] }
  0x84   : > { %v344_v7 = vpop.permute.xlu1 %343  ;;  %v335_v8 = vpop.permute.xlu0 %334 }
  0x88   : > { %v346_v14 = vpop.permute.xlu1 %345  ;;  %v337_v15 = vpop.permute.xlu0 %336 }
  0x89   : > { %v348_v17 = vsel %vm347_vm4, %v344_v7, %v346_v14  ;;  %v349_v18 = vsel %vm347_vm4, %v346_v14, %v344_v7  ;;  %v339_v19 = vsel %vm338_vm5, %v335_v8, %v337_v15  ;;  %v340_v20 = vsel %vm338_vm5, %v337_v15, %v335_v8 }
  0x8a   : > { %v350_v21 = vmul.f32 %v841_v10, %v348_v17  ;;  %v351_v22 = vmul.f32 %v842_v11, %v349_v18  ;;  %v341_v23 = vmul.f32 %v839_v12, %v340_v20  ;;  %v342_v24 = vmul.f32 %v840_v13, %v339_v19 }
  0x8c   : > { %v873_v25 = vpack.c.bf16 %v351_v22, %v350_v21  ;;  %359 = vrot.lane.b32.xlu1 %v350_v21, %s942_s25  ;;  %v355_v26 = vsel %vm354_vm6, %v341_v23, %v352_v16  ;;  %v356_v27 = vsel %vm354_vm6, %v342_v24, %v279_v0 }
  0x8d   : > { %357 = vrot.lane.b32.xlu0 %v355_v26, %s942_s25  ;;  %v872_v28 = vpack.c.bf16 %v356_v27, %v355_v26 }
  0x8e   : > { %419 = vst [vmem:[#allocation2 + $0x18] sm:$0x33] %v873_v25 }
  0x90   : > { %363 = vrot.lane.b32.xlu1 %v351_v22, %s942_s25 }
  0x91   : > { %361 = vrot.lane.b32.xlu0 %v356_v27, %s942_s25 }
  0x94   : > { %376 = vrot.lane.b32.xlu1 %v350_v21, %s943_s26 }
  0x95   : > { %374 = vrot.lane.b32.xlu0 %v355_v26, %s943_s26  ;;  %v442_v30 = vld [vmem:[#allocation2 + $0x18] sm:$0x33] }
  0x96   : > { %v853_v31 = vcombine.high %v872_v28, %v442_v30  ;;  %v852_v32 = vcombine.low %v872_v28, %v442_v30 }
  0x98   : > { %380 = vrot.lane.b32.xlu1 %v351_v22, %s943_s26  ;;  %854 = vmatprep.subr.msk.bf16.mxu1 %vm455_vm7, %v853_v31  ;;  %v457_v33 = vsel %vm455_vm7, %v852_v32, 0 }
  0x99   : > { %378 = vrot.lane.b32.xlu0 %v356_v27, %s943_s26  ;;  %463 = vmatpush1.bf16.msra.mxu1 %v457_v33 }
  0x9c   : > { %855 = vmatmul.mubr.msk.bf16.vlgmr.msra.gmra.mrb[0].mxu1 %vm451_vm8, %v851_v34 }
  0xfe   : > { %v360_v35 = vpop.permute.xlu1 %359 }
  0xff   : > { %v358_v36 = vpop.permute.xlu0 %357 }
 0x102   : > { %v364_v38 = vpop.permute.xlu1 %363 }
 0x103   : > { %v369_v39 = vsel %vm365_vm10, %v364_v38, %v360_v35  ;;  %v362_v40 = vpop.permute.xlu0 %361  ;;  %v367_v43 = vsel %vm365_vm10, %v360_v35, %v364_v38 }
 0x104   : > { %v372_v41 = vmul.f32 %v843_v37, %v369_v39  ;;  %v368_v42 = vsel %vm365_vm10, %v362_v40, %v358_v36  ;;  %v366_v46 = vsel %vm365_vm10, %v358_v36, %v362_v40 }
 0x105   : > { %v370_v44 = vmul.f32 %v843_v37, %v368_v42 }
 0x106   : > { %v871_v45 = vpack.c.bf16 %v367_v43, %v372_v41  ;;  %v377_v47 = vpop.permute.xlu1 %376 }
 0x107   : > { %v870_v48 = vpack.c.bf16 %v366_v46, %v370_v44  ;;  %v375_v49 = vpop.permute.xlu0 %374 }
 0x108   : > { %404 = vst [vmem:[#allocation2 + $0x8] sm:$0x33] %v871_v45 }
 0x10a   : > { %v381_v51 = vpop.permute.xlu1 %380 }
 0x10b   : > { %v386_v52 = vsel %vm382_vm12, %v381_v51, %v377_v47  ;;  %v379_v53 = vpop.permute.xlu0 %378  ;;  %v384_v56 = vsel %vm382_vm12, %v377_v47, %v381_v51 }
 0x10c   : > { %v390_v54 = vmul.f32 %v844_v50, %v386_v52  ;;  %v385_v55 = vsel %vm382_vm12, %v379_v53, %v375_v49  ;;  %v383_v59 = vsel %vm382_vm12, %v375_v49, %v379_v53 }
 0x10d   : > { %v388_v57 = vmul.f32 %v844_v50, %v385_v55 }
 0x10e   : > { %v875_v58 = vpack.c.bf16 %v390_v54, %v384_v56 }
 0x10f   : > { %v874_v60 = vpack.c.bf16 %v388_v57, %v383_v59  ;;  %v437_v61 = vld [vmem:[#allocation2 + $0x8] sm:$0x33] }
 0x110   : > { %434 = vst [vmem:[#allocation2 + $0x28] sm:$0x33] %v875_v58  ;;  %v857_v62 = vcombine.high %v870_v48, %v437_v61  ;;  %v856_v63 = vcombine.low %v870_v48, %v437_v61 }
 0x112   : > { %858 = vmatprep.subr.msk.bf16.mxu0 %vm455_vm7, %v857_v62  ;;  %v515_v0 = vsel %vm455_vm7, %v856_v63, 0 }
 0x113   : > { %521 = vmatpush1.bf16.msra.mxu0 %v515_v0 }
 0x116   : > { %859 = vmatmul.mubr.msk.bf16.vlgmr.msra.gmra.mrb[0].mxu0 %vm451_vm8, %v435_v1 }
 0x117   : > { %v565_v2 = vld [vmem:[#allocation2 + $0x28] sm:$0x33]  ;;  %615 = vmatprep.mubr.bf16.mxu0 %v944_v29 }
 0x118   : > { %v862_v3 = vcombine.high %v874_v60, %v565_v2  ;;  %v861_v4 = vcombine.low %v874_v60, %v565_v2 }
 0x11a   : > { %863 = vmatprep.subr.msk.bf16.mxu0 %vm455_vm7, %v862_v3  ;;  %v578_v5 = vsel %vm455_vm7, %v861_v4, 0 }
 0x11b   : > { %584 = vmatpush1.bf16.msra.mxu0 %v578_v5 }
 0x122   : > { %864 = vmatmul.mubr.msk.bf16.vlgmr.msra.gmra.mrb[0].mxu0 %vm451_vm8, %v860_v6 }
 0x16f   : > { %v496_v7 = vpop.f32.mrb[0].mxu1 }
 0x170   : > { %v498_v8 = vpop.f32.mrb[1].mxu1 }
 0x171   : > { %v500_v9 = vpop.f32.mrb[2].mxu1 }
 0x172   : > { %v501_v10 = vpop.f32.mrb[3].mxu1 }
 0x1f5   : > { %v617_v11 = vpop.f32.mrb[0].mxu0 }
 0x1f6   : > { %v877_v12 = vadd.f32 %v617_v11, %v496_v7  ;;  %v619_v13 = vpop.f32.mrb[1].mxu0 }
 0x1f7   : > { %v878_v14 = vadd.f32 %v619_v13, %v498_v8  ;;  %v621_v15 = vpop.f32.mrb[2].mxu0 }
 0x1f8   : > { %v622_v16 = vpop.f32.mrb[3].mxu0  ;;  %v631_v17 = vmul.f32 %v877_v12, %v877_v12 }
 0x1f9   : > { %v876_v18 = vpack.c.bf16 %v878_v14, %v877_v12  ;;  %v626_v19 = vadd.f32 %v878_v14, %v877_v12  ;;  %v632_v20 = vmul.f32 %v878_v14, %v878_v14 }
 0x1fb   : > { %645 = vst [vmem:[%s259_s9] sm:$0xff] %v876_v18  ;;  %627 = vadd.xlane.f32.xlu0 %v626_v19  ;;  %v633_v21 = vadd.f32 %v632_v20, %v631_v17 }
 0x1fd   : > { %634 = vadd.xlane.f32.xlu1 %v633_v21 }
 0x288   : > { %v628_v22 = vpop.xlane.xlu0 %627 }
 0x289   : > { %630 = vst.msk [vmem:[%s266_s12] sm:$0xff] %vm629_vm13, %v628_v22 }
 0x28a   : > { %v635_v23 = vpop.xlane.xlu1 %634 }
 0x28b   : > { %636 = vst.msk [vmem:[%s273_s15] sm:$0xff] %vm629_vm13, %v635_v23 }
 0x28c PF: > { %s15_s17 = sadd.s32 1, %s937_s17   ;;  %s1057_s15 = smov %s933_s16 }
 0x28d   : > { %p12_p5 = scmp.ge.s32.totalorder %s15_s17, 4   ;;  %s1058_s16 = smov %s1060_s18 }
 0x28f   :  { %14 = sbr.rel (!%p12_p5) target bundleno = 2 (0x2), region = 95 }

// kernel: double_conv.4
= control target key start
LH: loop header
LB: loop body
LE: loop exit
PB: predicated region body
PF: predicated region fallthrough
CT: control target
= control target key end

     0   :  { %s1136_s21 = smov 0   ;;  %s1138_s22 = smov 0   ;;  %s1258_s0 = inlined_call_operand.vmem [shape: bf16[2,8,256], index: 0, kind: input, shape index: {}]   ;;  %s1259_s1 = inlined_call_operand.vmem [shape: f32[8,1], index: 1, kind: input, shape index: {}]   ;;  %s1260_s2 = inlined_call_operand.vmem [shape: f32[8,1], index: 2, kind: input, shape index: {}]   ;;  %s1261_s3 = inlined_call_operand.vmem [shape: bf16[3,8,24], index: 3, kind: input, shape index: {}]   ;;  %s1262_s4 = inlined_call_operand.vmem [shape: bf16[2,8,256], index: 4, kind: output, shape index: {0}]   ;;  %s1263_s5 = inlined_call_operand.vmem [shape: f32[2,8,1], index: 5, kind: output, shape index: {1}]   ;;  %s1264_s6 = inlined_call_operand.vmem [shape: f32[2,8,1], index: 6, kind: output, shape index: {2}]  }
   0x1   :  { %s1140_s23 = smov 0  }
   0x2 LB: > { %s29_s24 = sadd.s32 1, %s1089_s22  ;;  %p965_p0 = scmp.ge.s32.totalorder %s1093_s23, 1  ;;  %s1093_s23 = sphi %s1140_s23, %s17_s23   ;;  %s1089_s22 = sphi %s1138_s22, %s1266_s22   ;;  %s1085_s21 = sphi %s1136_s21, %s1265_s21  }
   0x3   : > { %p31_p1 = scmp.ge.s32.totalorder %s29_s24, 2  ;;  %p244_p2 = scmp.lt.s32.totalorder %s1093_s23, 3 }
   0x5   : > { %s1268_s24 = smov (%p31_p1, %s29_s24), 0  ;;  %p245_p3 = pnand %p965_p0, %p244_p2 }
   0x6   : > { %v336_v0 = vld [vmem:[%s1259_s1] sm:$0xff] (!%p245_p3)  ;;  %v1095_v1 = vmov (!%p245_p3), 0   ;;  %p296_p4 = scmp.lt.s32.totalorder (!%p245_p3), %s1085_s21, 1  ;;  %s1096_s9 = smov (!%p245_p3), 127   ;;  %v354_v14 = vlaneseq (!%p245_p3)  ;;  %v1099_v20 = vmov (!%p245_p3), 0.0   ;;  %vm573_vm6 = vcmask (!%p245_p3), 1043456  }
   0x7   : > { %248 = sbr.rel (%p245_p3) target bundleno = 772 (0x304), region = 36  ;;  %1070 = vset.pattern.permute.xlu0 (!%p245_p3), %v1095_v1  ;;  %677 = vmatprep.mubr.bf16.mxu0 (!%p245_p3), %v1095_v1  ;;  %v344_v2 = vld [vmem:[%s1260_s2] sm:$0xff] (!%p245_p3)  ;;  %s1097_s10 = smov (!%p245_p3), 1   ;;  %vm569_vm7 = vcmask (!%p245_p3), 195584   ;;  %vm762_vm12 = vcmask (!%p245_p3), 7168  }
   0x8   : > { %339 = vperm.xlu0 (!%p245_p3), %1070, %v336_v0   ;;  %612 = vmatprep.mubr.bf16.mxu1 (!%p245_p3), %v1095_v1  ;;  %s1098_s11 = smov (!%p245_p3), 16   ;;  %v1171_v15 = vand.u32 (!%p245_p3), 127, %v354_v14  ;;  %s1100_s12 = smov (!%p245_p3), 112   ;;  %v987_v41 = vld [vmem:[%s1261_s3 + $0x4] sm:$0xf] (!%p245_p3) }
   0xa   : > { %v1174_v16 = vadd.s32 (!%p245_p3), 128, %v1171_v15  ;;  %v361_v17 = vand.u32 (!%p245_p3), 15, %v1171_v15  ;;  %vm409_vm2 = vcmp.lt.s32.totalorder (!%p245_p3), %v1171_v15, 1  ;;  %vm418_vm5 = vcmp.lt.s32.totalorder (!%p245_p3), %v1171_v15, 127 }
   0xb   : > { %vm393_vm8 = vcmp.ge.s32.totalorder (!%p245_p3), %v1171_v15, 16  ;;  %vm435_vm9 = vcmp.lt.s32.totalorder (!%p245_p3), %v1171_v15, 16  ;;  %vm460_vm11 = vcmp.lt.s32.totalorder (!%p245_p3), %v1171_v15, 112 }
   0xc   : > { %347 = vperm.xlu0 (!%p245_p3), %1070, %v344_v2   ;;  %v368_v18 = vand.u32 (!%p245_p3), 15, %v1174_v16  ;;  %vm381_vm0 = vcmp.ne.s32.totalorder (!%p245_p3), %v361_v17, 0  ;;  %vm387_vm3 = vcmp.ne.s32.totalorder (!%p245_p3), %v361_v17, 15  ;;  %v976_v45 = vsel (!%p245_p3), %vm393_vm8, 1.0, %v1099_v20 }
   0xd   : > { %v972_v21 = vsel (!%p245_p3), %vm381_vm0, 1.0, %v1099_v20  ;;  %v974_v28 = vsel (!%p245_p3), %vm387_vm3, 1.0, %v1099_v20  ;;  %vm400_vm10 = vcmp.lt.s32.totalorder (!%p245_p3), %v1174_v16, 240 }
   0xe   : > { %s1270_s21 = smov (!%p296_p4, %s1085_s21), 1  ;;  %vm382_vm1 = vcmp.ne.s32.totalorder %v368_v18, 0  ;;  %vm388_vm4 = vcmp.ne.s32.totalorder %v368_v18, 15 }
   0xf   : > { %s1163_s29 = sshll.u32 %s1270_s21, 3  ;;  %v973_v22 = vsel %vm382_vm1, 1.0, %v1099_v20  ;;  %v975_v29 = vsel %vm388_vm4, 1.0, %v1099_v20 }
  0x10   : > { %s300_s8 = scalar_lea.vmem %s1258_s0, %s1163_s29  ;;  %s313_s21 = scalar_lea.vmem %s1262_s4, %s1163_s29 }
  0x11   : > { %v333_v3 = vld [vmem:[%s300_s8] sm:$0xff]  ;;  %s320_s27 = scalar_lea.vmem %s1263_s5, %s1163_s29  ;;  %s327_s7 = scalar_lea.vmem %s1264_s6, %s1163_s29 }
  0x12   : > { %v334_v4 = vunpack.c.l.bf16 %v333_v3  ;;  %v335_v6 = vunpack.c.h.bf16 %v333_v3  ;;  %v977_v3 = vsel %vm400_vm10, 1.0, %v1099_v20 }
  0x87   : > { %v340_v5 = vpop.permute.xlu0 %339 }
  0x88   : > { %v342_v7 = vmul.f32 %v340_v5, %v334_v4  ;;  %v343_v9 = vmul.f32 %v340_v5, %v335_v6  ;;  %v544_v5 = vld [vmem:[%s1261_s3] sm:$0xf] }
  0x8b   : > { %v348_v8 = vpop.permute.xlu0 %347 }
  0x8c   : > { %v350_v10 = vadd.f32 %v348_v8, %v342_v7  ;;  %v351_v11 = vadd.f32 %v348_v8, %v343_v9 }
  0x8e   : > { %v352_v12 = vmax.f32 %v350_v10, 0.0  ;;  %v353_v13 = vmax.f32 %v351_v11, 0.0 }
  0x90   : > { %414 = vrot.lane.b32.xlu0 %v352_v12, %s1096_s9  ;;  %405 = vrot.lane.b32.xlu1 %v352_v12, %s1097_s10 }
  0x94   : > { %407 = vrot.lane.b32.xlu1 %v353_v13, %s1097_s10 }
  0x98   : > { %416 = vrot.lane.b32.xlu1 %v353_v13, %s1096_s9 }
  0x9c   : > { %425 = vrot.lane.b32.xlu1 %v352_v12, %s1098_s11 }
  0xa0   : > { %431 = vrot.lane.b32.xlu1 %v353_v13, %s1098_s11 }
 0x102   : > { %v406_v19 = vpop.permute.xlu1 %405  ;;  %v415_v30 = vpop.permute.xlu0 %414 }
 0x106   : > { %v408_v23 = vpop.permute.xlu1 %407 }
 0x107   : > { %v410_v24 = vsel %vm409_vm2, %v406_v19, %v408_v23  ;;  %v411_v25 = vsel %vm409_vm2, %v408_v23, %v406_v19 }
 0x108   : > { %v412_v26 = vmul.f32 %v972_v21, %v411_v25  ;;  %v413_v27 = vmul.f32 %v973_v22, %v410_v24  ;;  %v1000_v22 = vld [vmem:[%s1261_s3 + $0x8] sm:$0xf] }
 0x10a   : > { %423 = vrot.lane.b32.xlu0 %v412_v26, %s1098_s11  ;;  %v417_v31 = vpop.permute.xlu1 %416  ;;  %v1023_v32 = vpack.c.bf16 %v353_v13, %v413_v27  ;;  %v1022_v33 = vpack.c.bf16 %v352_v12, %v412_v26 }
 0x10b   : > { %v419_v34 = vsel %vm418_vm5, %v415_v30, %v417_v31  ;;  %v420_v35 = vsel %vm418_vm5, %v417_v31, %v415_v30 }
 0x10c   : > { %v421_v36 = vmul.f32 %v974_v28, %v419_v34  ;;  %v422_v37 = vmul.f32 %v975_v29, %v420_v35  ;;  %580 = vmatprep.subr.bf16.mxu1 %v1023_v32 }
 0x10d   : > { %581 = vmatpush1.bf16.msra.mxu1 %v1022_v33 }
 0x10e   : > { %v1025_v38 = vpack.c.bf16 %v422_v37, %v422_v37  ;;  %429 = vrot.lane.b32.xlu0 %v413_v27, %s1098_s11  ;;  %433 = vrot.lane.b32.xlu1 %v422_v37, %s1098_s11  ;;  %v1024_v39 = vpack.c.bf16 %v421_v36, %v421_v36  ;;  %v426_v42 = vpop.permute.xlu1 %425 }
 0x110   : > { %992 = vmatprep.subr.msk.bf16.mxu1 %vm573_vm6, %v1025_v38  ;;  %v575_v40 = vsel %vm573_vm6, %v1024_v39, 0 }
 0x111   : > { %583 = vmatpush1.bf16.msra.mxu1 %v575_v40 }
 0x112   : > { %450 = vrot.lane.b32.xlu1 %v352_v12, %s1100_s12  ;;  %427 = vrot.lane.b32.xlu0 %v421_v36, %s1098_s11  ;;  %v432_v43 = vpop.permute.xlu1 %431 }
 0x113   : > { %v440_v46 = vsel %vm435_vm9, %v432_v43, %v426_v42  ;;  %v437_v51 = vsel %vm435_vm9, %v426_v42, %v432_v43 }
 0x114   : > { %993 = vmatmul.mubr.msk.bf16.vlgmr.msra.gmra.mrb[0].mxu1 %vm569_vm7, %v987_v41  ;;  %v444_v52 = vmul.f32 %v976_v45, %v440_v46 }
 0x116   : > { %456 = vrot.lane.b32.xlu1 %v353_v13, %s1100_s12  ;;  %448 = vrot.lane.b32.xlu0 %v412_v26, %s1100_s12 }
 0x11a   : > { %458 = vrot.lane.b32.xlu1 %v422_v37, %s1100_s12  ;;  %454 = vrot.lane.b32.xlu0 %v413_v27, %s1100_s12 }
 0x11e   : > { %452 = vrot.lane.b32.xlu0 %v421_v36, %s1100_s12 }
 0x17c   : > { %v424_v44 = vpop.permute.xlu0 %423 }
 0x180   : > { %v430_v47 = vpop.permute.xlu0 %429  ;;  %v434_v48 = vpop.permute.xlu1 %433 }
 0x181   : > { %v439_v49 = vsel %vm435_vm9, %v430_v47, %v424_v44  ;;  %v436_v50 = vsel %vm435_vm9, %v424_v44, %v430_v47 }
 0x182   : > { %v442_v53 = vmul.f32 %v976_v45, %v439_v49  ;;  %v1027_v54 = vpack.c.bf16 %v437_v51, %v436_v50 }
 0x184   : > { %v428_v55 = vpop.permute.xlu0 %427  ;;  %645 = vmatprep.subr.bf16.mxu0 %v1027_v54  ;;  %v451_v56 = vpop.permute.xlu1 %450  ;;  %v1026_v57 = vpack.c.bf16 %v444_v52, %v442_v53 }
 0x185   : > { %v438_v58 = vsel %vm435_vm9, %v428_v55, %v434_v48  ;;  %v441_v59 = vsel %vm435_vm9, %v434_v48, %v428_v55 }
 0x186   : > { %v446_v60 = vmul.f32 %v976_v45, %v441_v59  ;;  %v1029_v61 = vpack.c.bf16 %v438_v58, %v438_v58  ;;  %646 = vmatpush1.bf16.msra.mxu0 %v1026_v57 }
 0x188   : > { %v1028_v62 = vpack.c.bf16 %v446_v60, %v446_v60  ;;  %v449_v63 = vpop.permute.xlu0 %448  ;;  %998 = vmatprep.subr.msk.bf16.mxu0 %vm573_vm6, %v1029_v61  ;;  %v457_v0 = vpop.permute.xlu1 %456 }
 0x189   : > { %v465_v4 = vsel %vm460_vm11, %v457_v0, %v451_v56  ;;  %v462_v11 = vsel %vm460_vm11, %v451_v56, %v457_v0 }
 0x18a   : > { %v640_v2 = vsel %vm573_vm6, %v1028_v62, 0  ;;  %v470_v8 = vmul.f32 %v977_v3, %v465_v4 }
 0x18b   : > { %648 = vmatpush1.bf16.msra.mxu0 %v640_v2 }
 0x18c   : > { %v455_v6 = vpop.permute.xlu0 %454  ;;  %v459_v12 = vpop.permute.xlu1 %458 }
 0x18d   : > { %v464_v7 = vsel %vm460_vm11, %v455_v6, %v449_v63  ;;  %v461_v9 = vsel %vm460_vm11, %v449_v63, %v455_v6 }
 0x18e   : > { %v468_v10 = vmul.f32 %v977_v3, %v464_v7  ;;  %999 = vmatmul.mubr.msk.bf16.vlgmr.msra.gmra.mrb[0].mxu0 %vm569_vm7, %v544_v5  ;;  %v1030_v16 = vpack.c.bf16 %v462_v11, %v461_v9 }
 0x18f   : > { %748 = vmatprep.mubr.bf16.mxu0 %v1095_v1 }
 0x190   : > { %v453_v13 = vpop.permute.xlu0 %452  ;;  %v1031_v14 = vpack.c.bf16 %v470_v8, %v468_v10 }
 0x191   : > { %v463_v17 = vsel %vm460_vm11, %v453_v13, %v459_v12  ;;  %v466_v18 = vsel %vm460_vm11, %v459_v12, %v453_v13 }
 0x192   : > { %v472_v19 = vmul.f32 %v977_v3, %v466_v18  ;;  %v1032_v20 = vpack.c.bf16 %v463_v17, %v463_v17  ;;  %716 = vmatprep.subr.bf16.mxu0 %v1031_v14 }
 0x193   : > { %717 = vmatpush1.bf16.msra.mxu0 %v1030_v16 }
 0x194   : > { %v1033_v21 = vpack.c.bf16 %v472_v19, %v472_v19  ;;  %v711_v1 = vsel %vm573_vm6, %v1032_v20, 0 }
 0x196   : > { %1005 = vmatprep.subr.msk.bf16.mxu0 %vm573_vm6, %v1033_v21 }
 0x197   : > { %719 = vmatpush1.bf16.msra.mxu0 %v711_v1 }
 0x19a   : > { %1006 = vmatmul.mubr.msk.bf16.vlgmr.msra.gmra.mrb[0].mxu0 %vm569_vm7, %v1000_v22 }
 0x1e7   : > { %v614_v23 = vpop.f32.mrb[0].mxu1 }
 0x1e8   : > { %v616_v15 = vpop.f32.mrb[1].mxu1 }
 0x1e9   : > { %v618_v24 = vpop.f32.mrb[2].mxu1 }
 0x1ea   : > { %v619_v25 = vpop.f32.mrb[3].mxu1 }
 0x26d   : > { %v750_v26 = vpop.f32.mrb[0].mxu0 }
 0x26e   : > { %v1034_v27 = vadd.f32 %v750_v26, %v614_v23  ;;  %v752_v28 = vpop.f32.mrb[1].mxu0 }
 0x26f   : > { %v1035_v29 = vadd.f32 %v752_v28, %v616_v15  ;;  %v754_v30 = vpop.f32.mrb[2].mxu0 }
 0x270   : > { %v755_v31 = vpop.f32.mrb[3].mxu0  ;;  %v764_v32 = vmul.f32 %v1034_v27, %v1034_v27 }
 0x271   : > { %v1021_v33 = vpack.c.bf16 %v1035_v29, %v1034_v27  ;;  %v759_v34 = vadd.f32 %v1035_v29, %v1034_v27  ;;  %v765_v35 = vmul.f32 %v1035_v29, %v1035_v29 }
 0x273   : > { %778 = vst [vmem:[%s313_s21] sm:$0xff] %v1021_v33  ;;  %760 = vadd.xlane.f32.xlu0 %v759_v34  ;;  %v766_v36 = vadd.f32 %v765_v35, %v764_v32 }
 0x275   : > { %767 = vadd.xlane.f32.xlu1 %v766_v36 }
 0x300   : > { %v761_v37 = vpop.xlane.xlu0 %760 }
 0x301   : > { %763 = vst.msk [vmem:[%s320_s27] sm:$0xff] %vm762_vm12, %v761_v37 }
 0x302   : > { %v768_v38 = vpop.xlane.xlu1 %767 }
 0x303   : > { %769 = vst.msk [vmem:[%s327_s7] sm:$0xff] %vm762_vm12, %v768_v38 }
 0x304 PF: > { %s17_s23 = sadd.s32 1, %s1093_s23   ;;  %s1265_s21 = smov %s1089_s22 }
 0x305   : > { %p14_p5 = scmp.ge.s32.totalorder %s17_s23, 4   ;;  %s1266_s22 = smov %s1268_s24 }
 0x307   :  { %16 = sbr.rel (!%p14_p5) target bundleno = 2 (0x2), region = 103 }

</bundles_post_ra>
